<compile_context>
chip_gen: v6e
topology: v6e:2x2x1
jax: 0.10.0
libtpu: 0.0.40
codegen_flags: <defaults>
</compile_context>

<pallas_src>
import jax
import jax.numpy as jnp
from jax.experimental import pallas as pl
from jax.experimental.pallas import tpu as pltpu


def final_layer_kernel(x_ref, gamma_ref, beta_ref, w_ref, b_ref, o_ref):
    # Fused LayerNorm (eps=1e-6, biased variance, f32 stats) + Linear.
    # x_ref: (tm, H); gamma/beta: (1, H) f32; w_ref: (H, Ppad) storage dtype;
    # b_ref: (1, Ppad) f32; o_ref: (tm, Ppad).
    x = x_ref[...].astype(jnp.float32)
    # Single-pass statistics: one fewer per-element pass than the two-pass
    # form (VALU is the binding slot on v7x).  f32 accumulation; biased var
    # (matches PyTorch LayerNorm).  Clamp tiny negative cancellation residue.
    mean = jnp.mean(x, axis=-1, keepdims=True)
    mean_sq = jnp.mean(x * x, axis=-1, keepdims=True)
    var = jnp.maximum(mean_sq - mean * mean, 0.0)      # (tm, 1) — cheap
    inv = jax.lax.rsqrt(var + 1e-6)                    # EUP slot (~free)
    xc = x - mean                                      # materialized once
    y = xc * inv * gamma_ref[...] + beta_ref[...]      # gamma/beta already f32
    # Feed the MXU in the weight's storage dtype (bf16 in production); f32 acc.
    out = jnp.dot(y.astype(w_ref.dtype), w_ref[...],
                  preferred_element_type=jnp.float32)  # (tm, Ppad)
    out = out + b_ref[...]
    o_ref[...] = out.astype(o_ref.dtype)


def _round_up(a, b):
    return -(-a // b) * b


def final_layer(x, gamma, beta, w, b, *, tm=1024):
    """x: (B, T, H); gamma/beta: (H,); w: (H, P); b: (P,) -> (B, T, P)."""
    B, T, H = x.shape
    P = w.shape[1]
    M = B * T

    # --- Lane-dense output: pad projection width to a multiple of 128 lanes. ---
    # MXU cost is unchanged (an N<128 tile already wastes the array's output
    # width); the extra HBM writeback is a few % of total traffic, while the
    # stores become full unmasked vst (measured ~4.5x lower store-side stall).
    P_pad = max(128, _round_up(P, 128))
    if P_pad != P:
        w = jnp.pad(w, ((0, 0), (0, P_pad - P)))
        b = jnp.pad(b, ((0, P_pad - P),))

    xf = x.reshape(M, H)
    gamma2 = gamma.astype(jnp.float32).reshape(1, H)   # pre-cast once (wrapper)
    beta2 = beta.astype(jnp.float32).reshape(1, H)
    b2 = b.astype(jnp.float32).reshape(1, P_pad)

    x_itemsize = jnp.dtype(x.dtype).itemsize
    w_itemsize = jnp.dtype(w.dtype).itemsize
    out_itemsize = x_itemsize

    # Generation-aware VMEM budget (v5e/v6e: 128 MiB physical, v7x: 64 MiB).
    try:
        vmem_cap = int(pltpu.get_tpu_info().vmem_capacity_bytes)
    except Exception:
        vmem_cap = 64 * 1024 * 1024                    # conservative (v7x)
    vmem_limit = min(100 * 1024 * 1024, int(0.9 * vmem_cap))

    # --- Row-tile selection ----------------------------------------------------
    # Multiple of the sublane packing (8 for 32-bit, 16 for bf16) unless one
    # full-extent block covers everything.  Capped so double-buffered x/out
    # tiles + ~3x f32 LN temporaries + resident weights stay well inside VMEM
    # (v7x's 64 MiB is the binding case).  H (the LN reduction axis) is never
    # tiled, so a padded partial last row-tile only produces discarded rows.
    sub = 16 if x_itemsize < 4 else 8
    if M <= tm:
        tm = M                                  # single block; full extent is legal
    else:
        tm = max(sub, (tm // sub) * sub)
        const_bytes = 2 * H * 4 + H * P_pad * w_itemsize + P_pad * 4

        def working_set(t):
            return (2 * t * H * x_itemsize            # double-buffered x tile
                    + 2 * t * P_pad * out_itemsize    # double-buffered out tile
                    + 3 * t * H * 4                   # f32 LN intermediates
                    + const_bytes)                    # resident gamma/beta/W/b

        budget = int(0.45 * vmem_cap)
        while tm > sub and working_set(tm) > budget:
            tm = max(sub, ((tm // 2) // sub) * sub)

        # Prefer an even step count so v7x's 2 TensorCores stay balanced.
        nsteps = pl.cdiv(M, tm)
        if nsteps > 1 and nsteps % 2 == 1:
            tm_even = max(sub, _round_up(pl.cdiv(M, nsteps + 1), sub))
            if pl.cdiv(M, tm_even) % 2 == 0:
                tm = tm_even

    grid = (pl.cdiv(M, tm),)

    cost = pl.CostEstimate(
        flops=2 * M * H * P_pad + 8 * M * H,
        transcendentals=M,
        bytes_accessed=(M * H * x_itemsize + M * P_pad * out_itemsize
                        + H * P_pad * w_itemsize + 2 * H * 4 + P_pad * 4),
    )

    def _call(const_mode):
        kw = {} if const_mode is None else {"pipeline_mode": const_mode}
        return pl.pallas_call(
            final_layer_kernel,
            out_shape=jax.ShapeDtypeStruct((M, P_pad), x.dtype),
            grid_spec=pl.GridSpec(
                grid=grid,
                in_specs=[
                    pl.BlockSpec((tm, H), lambda i: (i, 0)),          # x rows (pipelined)
                    pl.BlockSpec((1, H), lambda i: (0, 0), **kw),     # LN weight (resident)
                    pl.BlockSpec((1, H), lambda i: (0, 0), **kw),     # LN bias   (resident)
                    pl.BlockSpec((H, P_pad), lambda i: (0, 0), **kw), # linear W  (resident)
                    pl.BlockSpec((1, P_pad), lambda i: (0, 0), **kw), # linear b  (resident)
                ],
                out_specs=pl.BlockSpec((tm, P_pad), lambda i: (i, 0)),
            ),
            # Rows are independent -> "parallel": shards the grid across the two
            # TensorCores on v7x; harmless no-op on single-TC v5e/v6e.
            compiler_params=pltpu.CompilerParams(
                dimension_semantics=("parallel",),
                vmem_limit_bytes=vmem_limit),
            cost_estimate=cost,
        )(xf, gamma2, beta2, w, b2)

    try:
        out = _call(pl.Buffered(1))   # single-buffer constant operands
    except Exception:
        # TODO(synk): pl.Buffered(1) single-buffering rejected on this JAX
        # version; fall back to default double-buffered constants.
        out = _call(None)

    return out[:, :P].reshape(B, T, P)


def reference(x, gamma, beta, w, b):
    xf = x.astype(jnp.float32)
    mean = jnp.mean(xf, axis=-1, keepdims=True)
    var = jnp.mean(jnp.square(xf - mean), axis=-1, keepdims=True)
    xn = (xf - mean) * jax.lax.rsqrt(var + 1e-6)
    y = xn * gamma.astype(jnp.float32) + beta.astype(jnp.float32)
    out = jnp.dot(y.astype(w.dtype), w, preferred_element_type=jnp.float32)
    out = out + b.astype(jnp.float32)
    return out.astype(x.dtype)


if __name__ == "__main__":
    key = jax.random.PRNGKey(0)
    kx, kw, kb, kg, kbt, kx2, kw2 = jax.random.split(key, 7)

    # --- Small-shape check (module-consistent sizes), f32 end to end. -------
    B, T, H, P = 2, 8, 32, 16   # batch, seq, hidden_size, patch_size
    x = jax.random.normal(kx, (B, T, H), dtype=jnp.float32)
    ln_gamma = jnp.ones((H,), jnp.float32) + 0.1 * jax.random.normal(kg, (H,), jnp.float32)
    ln_beta = 0.1 * jax.random.normal(kbt, (H,), jnp.float32)
    w = jax.random.normal(kw, (H, P), jnp.float32) * (1.0 / jnp.sqrt(H))
    b = 0.01 * jax.random.normal(kb, (P,), jnp.float32)

    out = jax.block_until_ready(final_layer(x, ln_gamma, ln_beta, w, b))
    ref = reference(x, ln_gamma, ln_beta, w, b)
    assert out.shape == (B, T, P)
    assert jnp.allclose(out, ref, atol=1e-4, rtol=1e-4), "f32 mismatch vs reference"

    # --- Multi-tile check: bf16, several grid steps incl. a partial last tile. ---
    B2, T2, H2, P2 = 4, 120, 256, 16          # M = 480 -> 4 tiles of 128, last partial
    x2 = jax.random.normal(kx2, (B2, T2, H2), dtype=jnp.float32).astype(jnp.bfloat16)
    g2 = jnp.ones((H2,), jnp.float32)
    bt2 = jnp.zeros((H2,), jnp.float32)
    w2 = (jax.random.normal(kw2, (H2, P2), jnp.float32) / jnp.sqrt(H2)).astype(jnp.bfloat16)
    bb2 = jnp.zeros((P2,), jnp.float32)

    out2 = jax.block_until_ready(final_layer(x2, g2, bt2, w2, bb2, tm=128))
    ref2 = reference(x2, g2, bt2, w2, bb2)
    assert out2.shape == (B2, T2, P2)
    assert jnp.allclose(out2.astype(jnp.float32), ref2.astype(jnp.float32),
                        atol=5e-2, rtol=5e-2), "bf16 mismatch vs reference"

    print("KERNEL_OK")
</pallas_src>

<mosaic_0001>
module attributes {stable_mosaic.version = 11 : i64} {
  func.func @final_layer_kernel(%arg0: i32, %arg1: memref<16x32xf32, #tpu.memory_space<vmem>>, %arg2: memref<1x32xf32, #tpu.memory_space<vmem>>, %arg3: memref<1x32xf32, #tpu.memory_space<vmem>>, %arg4: memref<32x128xf32, #tpu.memory_space<vmem>>, %arg5: memref<1x128xf32, #tpu.memory_space<vmem>>, %arg6: memref<16x128xf32, #tpu.memory_space<vmem>>) attributes {dimension_semantics = [#tpu.dimension_semantics<parallel>], iteration_bounds = array<i64: 1>, scalar_prefetch = 0 : i64, scratch_operands = 0 : i64, tpu.core_type = #tpu.core_type<tc>, window_params = [{transform_indices = @transform_0, window_bounds = array<i64: 16, 32>}, {pipeline_mode = #tpu.pipeline_mode<synchronous>, transform_indices = @transform_1, window_bounds = array<i64: 1, 32>}, {pipeline_mode = #tpu.pipeline_mode<synchronous>, transform_indices = @transform_2, window_bounds = array<i64: 1, 32>}, {pipeline_mode = #tpu.pipeline_mode<synchronous>, transform_indices = @transform_3, window_bounds = array<i64: 32, 128>}, {pipeline_mode = #tpu.pipeline_mode<synchronous>, transform_indices = @transform_4, window_bounds = array<i64: 1, 128>}, {transform_indices = @transform_5, window_bounds = array<i64: 16, 128>}]} {
    %c0 = arith.constant 0 : index
    %c0_0 = arith.constant 0 : index
    %0 = vector.load %arg1[%c0, %c0_0] : memref<16x32xf32, #tpu.memory_space<vmem>>, vector<16x32xf32>
    %cst = arith.constant dense<0.000000e+00> : vector<16xf32>
    %1 = vector.multi_reduction <add>, %0, %cst [1] : vector<16x32xf32> to vector<16xf32>
    %2 = vector.shape_cast %1 : vector<16xf32> to vector<16x1xf32>
    %cst_1 = arith.constant 3.200000e+01 : f32
    %3 = vector.broadcast %cst_1 : f32 to vector<16x1xf32>
    %4 = arith.divf %2, %3 : vector<16x1xf32>
    %5 = arith.mulf %0, %0 : vector<16x32xf32>
    %cst_2 = arith.constant dense<0.000000e+00> : vector<16xf32>
    %6 = vector.multi_reduction <add>, %5, %cst_2 [1] : vector<16x32xf32> to vector<16xf32>
    %7 = vector.shape_cast %6 : vector<16xf32> to vector<16x1xf32>
    %cst_3 = arith.constant 3.200000e+01 : f32
    %8 = vector.broadcast %cst_3 : f32 to vector<16x1xf32>
    %9 = arith.divf %7, %8 : vector<16x1xf32>
    %10 = arith.mulf %4, %4 : vector<16x1xf32>
    %11 = arith.subf %9, %10 : vector<16x1xf32>
    %cst_4 = arith.constant 0.000000e+00 : f32
    %12 = vector.broadcast %cst_4 : f32 to vector<16x1xf32>
    %13 = arith.maximumf %11, %12 : vector<16x1xf32>
    %cst_5 = arith.constant 9.99999997E-7 : f32
    %14 = vector.broadcast %cst_5 : f32 to vector<16x1xf32>
    %15 = arith.addf %13, %14 : vector<16x1xf32>
    %16 = math.rsqrt %15 : vector<16x1xf32>
    %17 = vector.broadcast %4 : vector<16x1xf32> to vector<16x32xf32>
    %18 = arith.subf %0, %17 : vector<16x32xf32>
    %19 = vector.broadcast %16 : vector<16x1xf32> to vector<16x32xf32>
    %20 = arith.mulf %18, %19 : vector<16x32xf32>
    %c0_6 = arith.constant 0 : index
    %c0_7 = arith.constant 0 : index
    %21 = vector.load %arg2[%c0_6, %c0_7] : memref<1x32xf32, #tpu.memory_space<vmem>>, vector<1x32xf32>
    %22 = vector.broadcast %21 : vector<1x32xf32> to vector<16x32xf32>
    %23 = arith.mulf %20, %22 : vector<16x32xf32>
    %c0_8 = arith.constant 0 : index
    %c0_9 = arith.constant 0 : index
    %24 = vector.load %arg3[%c0_8, %c0_9] : memref<1x32xf32, #tpu.memory_space<vmem>>, vector<1x32xf32>
    %25 = vector.broadcast %24 : vector<1x32xf32> to vector<16x32xf32>
    %26 = arith.addf %23, %25 : vector<16x32xf32>
    %c0_10 = arith.constant 0 : index
    %c0_11 = arith.constant 0 : index
    %27 = vector.load %arg4[%c0_10, %c0_11] : memref<32x128xf32, #tpu.memory_space<vmem>>, vector<32x128xf32>
    %cst_12 = arith.constant dense<0.000000e+00> : vector<16x128xf32>
    %28 = tpu.matmul %26, %27, %cst_12 {dimension_numbers = #tpu.dot_dimension_numbers<[1], [0], [0], [1], [0, 0, 1, 1], [], []>} : vector<16x32xf32>, vector<32x128xf32>, vector<16x128xf32> -> vector<16x128xf32>
    %c0_13 = arith.constant 0 : index
    %c0_14 = arith.constant 0 : index
    %29 = vector.load %arg5[%c0_13, %c0_14] : memref<1x128xf32, #tpu.memory_space<vmem>>, vector<1x128xf32>
    %30 = vector.broadcast %29 : vector<1x128xf32> to vector<16x128xf32>
    %31 = arith.addf %28, %30 : vector<16x128xf32>
    %c0_15 = arith.constant 0 : index
    %c0_16 = arith.constant 0 : index
    %32 = vector.load %arg6[%c0_15, %c0_16] : memref<16x128xf32, #tpu.memory_space<vmem>>, vector<16x128xf32>
    tpu.vector_store %arg6[%c0_15, %c0_16], %31 {strides = array<i32>} : memref<16x128xf32, #tpu.memory_space<vmem>>, vector<16x128xf32>,
    return
  }
  func.func @transform_0(%arg0: i32) -> (i32, i32) {
    %c0_i32 = arith.constant 0 : i32
    %c0_i32_0 = arith.constant 0 : i32
    return %arg0, %c0_i32 : i32, i32
  }
  func.func @transform_1(%arg0: i32) -> (i32, i32) {
    %c0_i32 = arith.constant 0 : i32
    %c0_i32_0 = arith.constant 0 : i32
    %c0_i32_1 = arith.constant 0 : i32
    return %c0_i32, %c0_i32_0 : i32, i32
  }
  func.func @transform_2(%arg0: i32) -> (i32, i32) {
    %c0_i32 = arith.constant 0 : i32
    %c0_i32_0 = arith.constant 0 : i32
    %c0_i32_1 = arith.constant 0 : i32
    return %c0_i32, %c0_i32_0 : i32, i32
  }
  func.func @transform_3(%arg0: i32) -> (i32, i32) {
    %c0_i32 = arith.constant 0 : i32
    %c0_i32_0 = arith.constant 0 : i32
    %c0_i32_1 = arith.constant 0 : i32
    return %c0_i32, %c0_i32_0 : i32, i32
  }
  func.func @transform_4(%arg0: i32) -> (i32, i32) {
    %c0_i32 = arith.constant 0 : i32
    %c0_i32_0 = arith.constant 0 : i32
    %c0_i32_1 = arith.constant 0 : i32
    return %c0_i32, %c0_i32_0 : i32, i32
  }
  func.func @transform_5(%arg0: i32) -> (i32, i32) {
    %c0_i32 = arith.constant 0 : i32
    %c0_i32_0 = arith.constant 0 : i32
    return %arg0, %c0_i32 : i32, i32
  }
}

module attributes {stable_mosaic.version = 11 : i64} {
  func.func @final_layer_kernel(%arg0: i32, %arg1: memref<16x32xf32, #tpu.memory_space<vmem>>, %arg2: memref<1x32xf32, #tpu.memory_space<vmem>>, %arg3: memref<1x32xf32, #tpu.memory_space<vmem>>, %arg4: memref<32x128xf32, #tpu.memory_space<vmem>>, %arg5: memref<1x128xf32, #tpu.memory_space<vmem>>, %arg6: memref<16x128xf32, #tpu.memory_space<vmem>>) attributes {dimension_semantics = [#tpu.dimension_semantics<parallel>], iteration_bounds = array<i64: 1>, scalar_prefetch = 0 : i64, scratch_operands = 0 : i64, tpu.core_type = #tpu.core_type<tc>, window_params = [{transform_indices = @transform_0, window_bounds = array<i64: 16, 32>}, {pipeline_mode = #tpu.pipeline_mode<synchronous>, transform_indices = @transform_1, window_bounds = array<i64: 1, 32>}, {pipeline_mode = #tpu.pipeline_mode<synchronous>, transform_indices = @transform_2, window_bounds = array<i64: 1, 32>}, {pipeline_mode = #tpu.pipeline_mode<synchronous>, transform_indices = @transform_3, window_bounds = array<i64: 32, 128>}, {pipeline_mode = #tpu.pipeline_mode<synchronous>, transform_indices = @transform_4, window_bounds = array<i64: 1, 128>}, {transform_indices = @transform_5, window_bounds = array<i64: 16, 128>}]} {
    %c0 = arith.constant 0 : index
    %c0_0 = arith.constant 0 : index
    %0 = vector.load %arg1[%c0, %c0_0] : memref<16x32xf32, #tpu.memory_space<vmem>>, vector<16x32xf32>
    %cst = arith.constant dense<0.000000e+00> : vector<16xf32>
    %1 = vector.multi_reduction <add>, %0, %cst [1] : vector<16x32xf32> to vector<16xf32>
    %2 = vector.shape_cast %1 : vector<16xf32> to vector<16x1xf32>
    %cst_1 = arith.constant 3.200000e+01 : f32
    %3 = vector.broadcast %cst_1 : f32 to vector<16x1xf32>
    %4 = arith.divf %2, %3 : vector<16x1xf32>
    %5 = arith.mulf %0, %0 : vector<16x32xf32>
    %cst_2 = arith.constant dense<0.000000e+00> : vector<16xf32>
    %6 = vector.multi_reduction <add>, %5, %cst_2 [1] : vector<16x32xf32> to vector<16xf32>
    %7 = vector.shape_cast %6 : vector<16xf32> to vector<16x1xf32>
    %cst_3 = arith.constant 3.200000e+01 : f32
    %8 = vector.broadcast %cst_3 : f32 to vector<16x1xf32>
    %9 = arith.divf %7, %8 : vector<16x1xf32>
    %10 = arith.mulf %4, %4 : vector<16x1xf32>
    %11 = arith.subf %9, %10 : vector<16x1xf32>
    %cst_4 = arith.constant 0.000000e+00 : f32
    %12 = vector.broadcast %cst_4 : f32 to vector<16x1xf32>
    %13 = arith.maximumf %11, %12 : vector<16x1xf32>
    %cst_5 = arith.constant 9.99999997E-7 : f32
    %14 = vector.broadcast %cst_5 : f32 to vector<16x1xf32>
    %15 = arith.addf %13, %14 : vector<16x1xf32>
    %16 = math.rsqrt %15 : vector<16x1xf32>
    %17 = vector.broadcast %4 : vector<16x1xf32> to vector<16x32xf32>
    %18 = arith.subf %0, %17 : vector<16x32xf32>
    %19 = vector.broadcast %16 : vector<16x1xf32> to vector<16x32xf32>
    %20 = arith.mulf %18, %19 : vector<16x32xf32>
    %c0_6 = arith.constant 0 : index
    %c0_7 = arith.constant 0 : index
    %21 = vector.load %arg2[%c0_6, %c0_7] : memref<1x32xf32, #tpu.memory_space<vmem>>, vector<1x32xf32>
    %22 = vector.broadcast %21 : vector<1x32xf32> to vector<16x32xf32>
    %23 = arith.mulf %20, %22 : vector<16x32xf32>
    %c0_8 = arith.constant 0 : index
    %c0_9 = arith.constant 0 : index
    %24 = vector.load %arg3[%c0_8, %c0_9] : memref<1x32xf32, #tpu.memory_space<vmem>>, vector<1x32xf32>
    %25 = vector.broadcast %24 : vector<1x32xf32> to vector<16x32xf32>
    %26 = arith.addf %23, %25 : vector<16x32xf32>
    %c0_10 = arith.constant 0 : index
    %c0_11 = arith.constant 0 : index
    %27 = vector.load %arg4[%c0_10, %c0_11] : memref<32x128xf32, #tpu.memory_space<vmem>>, vector<32x128xf32>
    %cst_12 = arith.constant dense<0.000000e+00> : vector<16x128xf32>
    %28 = tpu.matmul %26, %27, %cst_12 {dimension_numbers = #tpu.dot_dimension_numbers<[1], [0], [0], [1], [0, 0, 1, 1], [], []>} : vector<16x32xf32>, vector<32x128xf32>, vector<16x128xf32> -> vector<16x128xf32>
    %c0_13 = arith.constant 0 : index
    %c0_14 = arith.constant 0 : index
    %29 = vector.load %arg5[%c0_13, %c0_14] : memref<1x128xf32, #tpu.memory_space<vmem>>, vector<1x128xf32>
    %30 = vector.broadcast %29 : vector<1x128xf32> to vector<16x128xf32>
    %31 = arith.addf %28, %30 : vector<16x128xf32>
    %c0_15 = arith.constant 0 : index
    %c0_16 = arith.constant 0 : index
    %32 = vector.load %arg6[%c0_15, %c0_16] : memref<16x128xf32, #tpu.memory_space<vmem>>, vector<16x128xf32>
    tpu.vector_store %arg6[%c0_15, %c0_16], %31 {strides = array<i32>} : memref<16x128xf32, #tpu.memory_space<vmem>>, vector<16x128xf32>,
    return
  }
  func.func @transform_0(%arg0: i32) -> (i32, i32) {
    %c0_i32 = arith.constant 0 : i32
    %c0_i32_0 = arith.constant 0 : i32
    return %arg0, %c0_i32 : i32, i32
  }
  func.func @transform_1(%arg0: i32) -> (i32, i32) {
    %c0_i32 = arith.constant 0 : i32
    %c0_i32_0 = arith.constant 0 : i32
    %c0_i32_1 = arith.constant 0 : i32
    return %c0_i32, %c0_i32_0 : i32, i32
  }
  func.func @transform_2(%arg0: i32) -> (i32, i32) {
    %c0_i32 = arith.constant 0 : i32
    %c0_i32_0 = arith.constant 0 : i32
    %c0_i32_1 = arith.constant 0 : i32
    return %c0_i32, %c0_i32_0 : i32, i32
  }
  func.func @transform_3(%arg0: i32) -> (i32, i32) {
    %c0_i32 = arith.constant 0 : i32
    %c0_i32_0 = arith.constant 0 : i32
    %c0_i32_1 = arith.constant 0 : i32
    return %c0_i32, %c0_i32_0 : i32, i32
  }
  func.func @transform_4(%arg0: i32) -> (i32, i32) {
    %c0_i32 = arith.constant 0 : i32
    %c0_i32_0 = arith.constant 0 : i32
    %c0_i32_1 = arith.constant 0 : i32
    return %c0_i32, %c0_i32_0 : i32, i32
  }
  func.func @transform_5(%arg0: i32) -> (i32, i32) {
    %c0_i32 = arith.constant 0 : i32
    %c0_i32_0 = arith.constant 0 : i32
    return %arg0, %c0_i32 : i32, i32
  }
}

</mosaic_0001>

<bundles_post_ra>
// kernel: tpu_custom_call.1
= control target key start
LH: loop header
LB: loop body
LE: loop exit
PB: predicated region body
PF: predicated region fallthrough
CT: control target
= control target key end

     0   :  { %10 = vsyncpa [#allocation3], 0  ;;  %s380_s0 = inlined_call_operand.hbm [shape: f32[16,32], index: 0, kind: input, shape index: {}]   ;;  %s381_s1 = inlined_call_operand.vmem [shape: f32[1,32], index: 1, kind: input, shape index: {}]   ;;  %s382_s2 = inlined_call_operand.vmem [shape: f32[1,32], index: 2, kind: input, shape index: {}]   ;;  %s383_s3 = inlined_call_operand.hbm [shape: f32[32,128], index: 3, kind: input, shape index: {}]   ;;  %s384_s4 = inlined_call_operand.vmem [shape: f32[1,128], index: 4, kind: input, shape index: {}]   ;;  %s385_s5 = inlined_call_operand.hbm [shape: f32[16,128], index: 5, kind: output, shape index: {}]  }
   0x1   :  { %11 = vsyncpa [#allocation6], 0 }
   0x2   :  { %12 = vsyncpa [#allocation4], 0  ;;  %s312_s18 = smov [#allocation2]  }
   0x3   :  { %s18_s19 = sshll.u32 %s312_s18, 4  ;;  %s19_s19 = int_to_ptr.vmem [resolvable:$true] %s18_s19 }
   0x4   :  { %s254_s20 = scalar_lea.vmem %s19_s19, 256  ;;  %p259_p1 = scmp.lt.s32.totalorder %s19_s19, %s19_s19 }
   0x5   :  { %p255_p0 = scmp.ne.s32.totalorder %s19_s19, %s254_s20  ;;  %p260_p2 = scmp.lt.s32.totalorder %s254_s20, %s254_s20 }
   0x7   :  { %p261_p3 = por %p260_p2, %p259_p1 }
   0x9   :  { %p262_p4 = pnand %p261_p3, %p255_p0 }
   0xb   :  { %265 = shalt.err (!%p262_p4)
}
   0xc   :  { %s313_s21 = smov 128   ;;  %s314_s22 = smov 8  }
   0xd   :  { %24 = dma.hbm_to_vmem [thread:$0]  %s380_s0, 256, %s19_s19, [#allocation3], %s313_s21, %s313_s21, %s314_s22  }
   0xe   :  { %s315_s25 = smov [#allocation5]  }
   0xf   :  { %s34_s26 = sshll.u32 %s315_s25, 4  ;;  %s35_s26 = int_to_ptr.vmem [resolvable:$true] %s34_s26 }
  0x10   :  { %s274_s27 = scalar_lea.vmem %s35_s26, 512  ;;  %p279_p6 = scmp.lt.s32.totalorder %s35_s26, %s35_s26 }
  0x11   :  { %p275_p5 = scmp.ne.s32.totalorder %s35_s26, %s274_s27  ;;  %p280_p7 = scmp.lt.s32.totalorder %s274_s27, %s274_s27 }
  0x13   :  { %p281_p8 = por %p280_p7, %p279_p6 }
  0x15   :  { %p282_p9 = pnand %p281_p8, %p275_p5 }
  0x17   :  { %285 = shalt.err (!%p282_p9)
}
  0x18   :  { %40 = dma.hbm_to_vmem [thread:$0]  %s383_s3, 512, %s35_s26, [#allocation6], %s313_s21, %s313_s21, %s314_s22  }
  0x19   :  { %306 = dma.done.wait [#allocation3], 256  }
  0x1a   :  { %307 = vsyncadd [#allocation3], 4294967040 }
  0x1b   :  { %308 = dma.done.wait [#allocation6], 512  }
  0x1c   :  { %309 = vsyncadd [#allocation6], 4294966784  ;;  %vm51_vm0 = vcmask 261120   ;;  %v49_v0 = vld [vmem:[#allocation2] sm:$0xff]  ;;  %v50_v1 = vld [vmem:[#allocation2 + $0x8] sm:$0xff] }
  0x1d   :  { %v52_v2 = vsel %vm51_vm0, %v49_v0, 0.0  ;;  %v61_v3 = vmul.f32 %v49_v0, %v49_v0  ;;  %v62_v4 = vmul.f32 %v50_v1, %v50_v1  ;;  %v55_v6 = vsel %vm51_vm0, %v50_v1, 0.0  ;;  %v106_v8 = vld [vmem:[#allocation5 + $0x18] sm:$0xff]  ;;  %v105_v9 = vld [vmem:[#allocation5 + $0x10] sm:$0xff]  ;;  %v104_v10 = vld [vmem:[#allocation5 + $0x8] sm:$0xff] }
  0x1e   :  { %53 = vadd.xlane.f32.xlu0 %v52_v2  ;;  %226 = vmatprep.subr.mxu0 %v106_v8  ;;  %v103_v11 = vld [vmem:[#allocation5] sm:$0xff]  ;;  %v215_v30 = vld [vmem:[%s381_s1] ss:$0 sm:$0xff]  ;;  %s316_s1 = smov [#allocation7]  }
  0x1f   :  { %v63_v5 = vsel %vm51_vm0, %v61_v3, 0.0  ;;  %v66_v7 = vsel %vm51_vm0, %v62_v4, 0.0  ;;  %227 = vmatpush3.msra.mxu0 %v106_v8  ;;  %v216_v32 = vld [vmem:[%s382_s2] ss:$0 sm:$0xff]  ;;  %s202_s9 = sshll.u32 %s316_s1, 4  ;;  %s203_s9 = int_to_ptr.vmem [resolvable:$true] %s202_s9 }
  0x20   :  { %64 = vadd.xlane.f32.xlu1 %v63_v5  ;;  %228 = vmatprep.subr.mxu0 %v105_v9  ;;  %v217_v40 = vld [vmem:[%s384_s4] ss:$0 sm:$0xff]  ;;  %s286_s2 = scalar_lea.vmem %s203_s9, 256  ;;  %p291_p11 = scmp.lt.s32.totalorder %s203_s9, %s203_s9 }
  0x21   :  { %229 = vmatpush3.msra.mxu0 %v105_v9  ;;  %p287_p10 = scmp.ne.s32.totalorder %s203_s9, %s286_s2  ;;  %p292_p12 = scmp.lt.s32.totalorder %s286_s2, %s286_s2 }
  0x22   :  { %56 = vadd.xlane.f32.xlu0 %v55_v6  ;;  %230 = vmatprep.subr.mxu0 %v104_v10 }
  0x23   :  { %231 = vmatpush3.msra.mxu0 %v104_v10  ;;  %p293_p13 = por %p292_p12, %p291_p11 }
  0x24   :  { %67 = vadd.xlane.f32.xlu1 %v66_v7  ;;  %232 = vmatprep.subr.mxu0 %v103_v11 }
  0x25   :  { %233 = vmatpush3.msra.mxu0 %v103_v11  ;;  %p294_p0 = pnand %p293_p13, %p287_p10 }
  0xa7   :  { %v54_v12 = vpop.xlane.xlu0 %53 }
  0xa8   :  { %v59_v13 = vmul.f32 0.03125, %v54_v12 }
  0xa9   :  { %v65_v14 = vpop.xlane.xlu1 %64 }
  0xaa   :  { %v71_v15 = vmul.f32 %v59_v13, %v59_v13  ;;  %v69_v16 = vmul.f32 0.03125, %v65_v14  ;;  %v81_v28 = vsub.f32 %v49_v0, %v59_v13 }
  0xab   :  { %v57_v17 = vpop.xlane.xlu0 %56 }
  0xac   :  { %v73_v18 = vsub.f32 %v69_v16, %v71_v15  ;;  %v60_v19 = vmul.f32 0.03125, %v57_v17 }
  0xad   :  { %v68_v20 = vpop.xlane.xlu1 %67 }
  0xae   :  { %v75_v21 = vmax.f32 %v73_v18, 0.0  ;;  %v72_v22 = vmul.f32 %v60_v19, %v60_v19  ;;  %v70_v23 = vmul.f32 0.03125, %v68_v20  ;;  %v82_v33 = vsub.f32 %v50_v1, %v60_v19 }
  0xb0   :  { %v77_v24 = vadd.f32 1e-06, %v75_v21  ;;  %v74_v25 = vsub.f32 %v70_v23, %v72_v22 }
  0xb2   :  { %242 = vrsqrt.f32 %v77_v24  ;;  %v76_v26 = vmax.f32 %v74_v25, 0.0 }
  0xb4   :  { %v78_v27 = vadd.f32 1e-06, %v76_v26 }
  0xb6   :  { %244 = vrsqrt.f32 %v78_v27 }
  0xbf   :  { %v243_v29 = vpop.eup %242 }
  0xc0   :  { %v83_v31 = vmul.f32 %v243_v29, %v81_v28 }
  0xc2   :  { %v92_v34 = vmul.f32 %v215_v30, %v83_v31 }
  0xc3   :  { %v245_v35 = vpop.eup %244 }
  0xc4   :  { %v84_v36 = vmul.f32 %v245_v35, %v82_v33  ;;  %v101_v37 = vadd.f32 %v216_v32, %v92_v34 }
  0xc6   :  { %v93_v38 = vmul.f32 %v215_v30, %v84_v36  ;;  %234 = vmatprep.mubr.msk.f32.mxu0 %vm51_vm0, %v101_v37 }
  0xc8   :  { %v102_v39 = vadd.f32 %v216_v32, %v93_v38 }
  0xca   :  { %235 = vmatmul.mubr.msk.f32.vlgmr.msra.gmra.mxu0 %vm51_vm0, %v102_v39 }
 0x18a   :  { %v236_v41 = vpop.f32.mrf.mxu0 }
 0x18b   :  { %v192_v42 = vadd.f32 %v236_v41, %v217_v40 }
 0x18c   :  { %v186_v43 = vpop.f32.mrf.mxu0 }
 0x18d   :  { %196 = vst [vmem:[#allocation7 + $0x8] sm:$0xff] %v192_v42  ;;  %v187_v44 = vadd.f32 %v217_v40, %v186_v43 }
 0x18f   :  { %195 = vst [vmem:[#allocation7] sm:$0xff] %v187_v44 }
 0x190   :  { %297 = shalt.err (!%p294_p0)
}
 0x191   :  { %208 = dma.vmem_to_hbm [thread:$0]  %s203_s9, 256, %s385_s5, [#allocation4], %s313_s21, %s313_s21, %s314_s22  }
 0x192   :  { %310 = dma.done.wait [#allocation4], 256  }
 0x193   :  { %311 = vsyncadd [#allocation4], 4294967040 }
 0x194   :  { %212 = vsyncpa [#allocation3], 1 }
 0x195   :  { %213 = vsyncpa [#allocation6], 1 }
 0x196   :  { %214 = vsyncpa [#allocation4], 1 }

// kernel: tpu_custom_call.1
= control target key start
LH: loop header
LB: loop body
LE: loop exit
PB: predicated region body
PF: predicated region fallthrough
CT: control target
= control target key end

     0   :  { %10 = vsyncpa [#allocation3], 0  ;;  %s380_s0 = inlined_call_operand.hbm [shape: f32[16,32], index: 0, kind: input, shape index: {}]   ;;  %s381_s1 = inlined_call_operand.vmem [shape: f32[1,32], index: 1, kind: input, shape index: {}]   ;;  %s382_s2 = inlined_call_operand.vmem [shape: f32[1,32], index: 2, kind: input, shape index: {}]   ;;  %s383_s3 = inlined_call_operand.hbm [shape: f32[32,128], index: 3, kind: input, shape index: {}]   ;;  %s384_s4 = inlined_call_operand.vmem [shape: f32[1,128], index: 4, kind: input, shape index: {}]   ;;  %s385_s5 = inlined_call_operand.hbm [shape: f32[16,128], index: 5, kind: output, shape index: {}]  }
   0x1   :  { %11 = vsyncpa [#allocation6], 0 }
   0x2   :  { %12 = vsyncpa [#allocation4], 0  ;;  %s312_s18 = smov [#allocation2]  }
   0x3   :  { %s18_s19 = sshll.u32 %s312_s18, 4  ;;  %s19_s19 = int_to_ptr.vmem [resolvable:$true] %s18_s19 }
   0x4   :  { %s254_s20 = scalar_lea.vmem %s19_s19, 256  ;;  %p259_p1 = scmp.lt.s32.totalorder %s19_s19, %s19_s19 }
   0x5   :  { %p255_p0 = scmp.ne.s32.totalorder %s19_s19, %s254_s20  ;;  %p260_p2 = scmp.lt.s32.totalorder %s254_s20, %s254_s20 }
   0x7   :  { %p261_p3 = por %p260_p2, %p259_p1 }
   0x9   :  { %p262_p4 = pnand %p261_p3, %p255_p0 }
   0xb   :  { %265 = shalt.err (!%p262_p4)
}
   0xc   :  { %s313_s21 = smov 128   ;;  %s314_s22 = smov 8  }
   0xd   :  { %24 = dma.hbm_to_vmem [thread:$0]  %s380_s0, 256, %s19_s19, [#allocation3], %s313_s21, %s313_s21, %s314_s22  }
   0xe   :  { %s315_s25 = smov [#allocation5]  }
   0xf   :  { %s34_s26 = sshll.u32 %s315_s25, 4  ;;  %s35_s26 = int_to_ptr.vmem [resolvable:$true] %s34_s26 }
  0x10   :  { %s274_s27 = scalar_lea.vmem %s35_s26, 512  ;;  %p279_p6 = scmp.lt.s32.totalorder %s35_s26, %s35_s26 }
  0x11   :  { %p275_p5 = scmp.ne.s32.totalorder %s35_s26, %s274_s27  ;;  %p280_p7 = scmp.lt.s32.totalorder %s274_s27, %s274_s27 }
  0x13   :  { %p281_p8 = por %p280_p7, %p279_p6 }
  0x15   :  { %p282_p9 = pnand %p281_p8, %p275_p5 }
  0x17   :  { %285 = shalt.err (!%p282_p9)
}
  0x18   :  { %40 = dma.hbm_to_vmem [thread:$0]  %s383_s3, 512, %s35_s26, [#allocation6], %s313_s21, %s313_s21, %s314_s22  }
  0x19   :  { %306 = dma.done.wait [#allocation3], 256  }
  0x1a   :  { %307 = vsyncadd [#allocation3], 4294967040 }
  0x1b   :  { %308 = dma.done.wait [#allocation6], 512  }
  0x1c   :  { %309 = vsyncadd [#allocation6], 4294966784  ;;  %vm51_vm0 = vcmask 261120   ;;  %v49_v0 = vld [vmem:[#allocation2] sm:$0xff]  ;;  %v50_v1 = vld [vmem:[#allocation2 + $0x8] sm:$0xff] }
  0x1d   :  { %v52_v2 = vsel %vm51_vm0, %v49_v0, 0.0  ;;  %v61_v3 = vmul.f32 %v49_v0, %v49_v0  ;;  %v62_v4 = vmul.f32 %v50_v1, %v50_v1  ;;  %v55_v6 = vsel %vm51_vm0, %v50_v1, 0.0  ;;  %v106_v8 = vld [vmem:[#allocation5 + $0x18] sm:$0xff]  ;;  %v105_v9 = vld [vmem:[#allocation5 + $0x10] sm:$0xff]  ;;  %v104_v10 = vld [vmem:[#allocation5 + $0x8] sm:$0xff] }
  0x1e   :  { %53 = vadd.xlane.f32.xlu0 %v52_v2  ;;  %226 = vmatprep.subr.mxu0 %v106_v8  ;;  %v103_v11 = vld [vmem:[#allocation5] sm:$0xff]  ;;  %v215_v30 = vld [vmem:[%s381_s1] ss:$0 sm:$0xff]  ;;  %s316_s1 = smov [#allocation7]  }
  0x1f   :  { %v63_v5 = vsel %vm51_vm0, %v61_v3, 0.0  ;;  %v66_v7 = vsel %vm51_vm0, %v62_v4, 0.0  ;;  %227 = vmatpush3.msra.mxu0 %v106_v8  ;;  %v216_v32 = vld [vmem:[%s382_s2] ss:$0 sm:$0xff]  ;;  %s202_s9 = sshll.u32 %s316_s1, 4  ;;  %s203_s9 = int_to_ptr.vmem [resolvable:$true] %s202_s9 }
  0x20   :  { %64 = vadd.xlane.f32.xlu1 %v63_v5  ;;  %228 = vmatprep.subr.mxu0 %v105_v9  ;;  %v217_v40 = vld [vmem:[%s384_s4] ss:$0 sm:$0xff]  ;;  %s286_s2 = scalar_lea.vmem %s203_s9, 256  ;;  %p291_p11 = scmp.lt.s32.totalorder %s203_s9, %s203_s9 }
  0x21   :  { %229 = vmatpush3.msra.mxu0 %v105_v9  ;;  %p287_p10 = scmp.ne.s32.totalorder %s203_s9, %s286_s2  ;;  %p292_p12 = scmp.lt.s32.totalorder %s286_s2, %s286_s2 }
  0x22   :  { %56 = vadd.xlane.f32.xlu0 %v55_v6  ;;  %230 = vmatprep.subr.mxu0 %v104_v10 }
  0x23   :  { %231 = vmatpush3.msra.mxu0 %v104_v10  ;;  %p293_p13 = por %p292_p12, %p291_p11 }
  0x24   :  { %67 = vadd.xlane.f32.xlu1 %v66_v7  ;;  %232 = vmatprep.subr.mxu0 %v103_v11 }
  0x25   :  { %233 = vmatpush3.msra.mxu0 %v103_v11  ;;  %p294_p0 = pnand %p293_p13, %p287_p10 }
  0xa7   :  { %v54_v12 = vpop.xlane.xlu0 %53 }
  0xa8   :  { %v59_v13 = vmul.f32 0.03125, %v54_v12 }
  0xa9   :  { %v65_v14 = vpop.xlane.xlu1 %64 }
  0xaa   :  { %v71_v15 = vmul.f32 %v59_v13, %v59_v13  ;;  %v69_v16 = vmul.f32 0.03125, %v65_v14  ;;  %v81_v28 = vsub.f32 %v49_v0, %v59_v13 }
  0xab   :  { %v57_v17 = vpop.xlane.xlu0 %56 }
  0xac   :  { %v73_v18 = vsub.f32 %v69_v16, %v71_v15  ;;  %v60_v19 = vmul.f32 0.03125, %v57_v17 }
  0xad   :  { %v68_v20 = vpop.xlane.xlu1 %67 }
  0xae   :  { %v75_v21 = vmax.f32 %v73_v18, 0.0  ;;  %v72_v22 = vmul.f32 %v60_v19, %v60_v19  ;;  %v70_v23 = vmul.f32 0.03125, %v68_v20  ;;  %v82_v33 = vsub.f32 %v50_v1, %v60_v19 }
  0xb0   :  { %v77_v24 = vadd.f32 1e-06, %v75_v21  ;;  %v74_v25 = vsub.f32 %v70_v23, %v72_v22 }
  0xb2   :  { %242 = vrsqrt.f32 %v77_v24  ;;  %v76_v26 = vmax.f32 %v74_v25, 0.0 }
  0xb4   :  { %v78_v27 = vadd.f32 1e-06, %v76_v26 }
  0xb6   :  { %244 = vrsqrt.f32 %v78_v27 }
  0xbf   :  { %v243_v29 = vpop.eup %242 }
  0xc0   :  { %v83_v31 = vmul.f32 %v243_v29, %v81_v28 }
  0xc2   :  { %v92_v34 = vmul.f32 %v215_v30, %v83_v31 }
  0xc3   :  { %v245_v35 = vpop.eup %244 }
  0xc4   :  { %v84_v36 = vmul.f32 %v245_v35, %v82_v33  ;;  %v101_v37 = vadd.f32 %v216_v32, %v92_v34 }
  0xc6   :  { %v93_v38 = vmul.f32 %v215_v30, %v84_v36  ;;  %234 = vmatprep.mubr.msk.f32.mxu0 %vm51_vm0, %v101_v37 }
  0xc8   :  { %v102_v39 = vadd.f32 %v216_v32, %v93_v38 }
  0xca   :  { %235 = vmatmul.mubr.msk.f32.vlgmr.msra.gmra.mxu0 %vm51_vm0, %v102_v39 }
 0x18a   :  { %v236_v41 = vpop.f32.mrf.mxu0 }
 0x18b   :  { %v192_v42 = vadd.f32 %v236_v41, %v217_v40 }
 0x18c   :  { %v186_v43 = vpop.f32.mrf.mxu0 }
 0x18d   :  { %196 = vst [vmem:[#allocation7 + $0x8] sm:$0xff] %v192_v42  ;;  %v187_v44 = vadd.f32 %v217_v40, %v186_v43 }
 0x18f   :  { %195 = vst [vmem:[#allocation7] sm:$0xff] %v187_v44 }
 0x190   :  { %297 = shalt.err (!%p294_p0)
}
 0x191   :  { %208 = dma.vmem_to_hbm [thread:$0]  %s203_s9, 256, %s385_s5, [#allocation4], %s313_s21, %s313_s21, %s314_s22  }
 0x192   :  { %310 = dma.done.wait [#allocation4], 256  }
 0x193   :  { %311 = vsyncadd [#allocation4], 4294967040 }
 0x194   :  { %212 = vsyncpa [#allocation3], 1 }
 0x195   :  { %213 = vsyncpa [#allocation6], 1 }
 0x196   :  { %214 = vsyncpa [#allocation4], 1 }

</bundles_post_ra>
